<compile_context>
chip_gen: v5e
topology: v5e:2x2
jax: 0.10.0
libtpu: 0.0.40
codegen_flags: <defaults>
</compile_context>

<pallas_src>
import functools

import numpy as np
import jax
import jax.numpy as jnp
from jax.experimental import pallas as pl
from jax.experimental.pallas import tpu as pltpu


# ---------------------------------------------------------------------------
# Kernels
# ---------------------------------------------------------------------------

def _mask_mul_kernel(x_ref, m_ref, o_ref):
    # x_ref: (TN, D2) row tile; m_ref: (1, D2) or (TN, D2) int8/float mask.
    o_ref[...] = x_ref[...] * m_ref[...].astype(x_ref.dtype)


def _scale_kernel(x_ref, o_ref, *, scale):
    # Eval path: uniform scalar multiply, scalar closed over at trace time.
    o_ref[...] = x_ref[...] * jnp.asarray(scale, dtype=x_ref.dtype)


# ---------------------------------------------------------------------------
# Tiling helpers (host-side, static)
# ---------------------------------------------------------------------------

_LANE_TARGET = 4096          # target (folded) lane width, in elements
_TILE_BYTES = 2 << 20        # ~2 MiB of x per block: near HBM roofline on
                             # v5e/v6e/v7x, fits v5e's 16 MiB scoped VMEM with
                             # double-buffered in/out (+ int8 mask).


def _min_sublane_rows(itemsize):
    # Minimum sublane packing: (8,128) f32, (16,128) bf16, (32,128) int8/fp8.
    return {4: 8, 2: 16, 1: 32}.get(int(itemsize), 8)


def _fold_factor(n_rows, d):
    """Largest divisor k of n_rows with k*d <= _LANE_TARGET (lane widening)."""
    if d <= 0 or n_rows <= 1:
        return 1
    k_max = max(1, min(n_rows, _LANE_TARGET // d))
    for k in range(k_max, 0, -1):
        if n_rows % k == 0:
            return k
    return 1


def _pick_row_tile(n_rows, lane_width, itemsize, sublane):
    """Row tile from a byte budget, rounded to the sublane multiple."""
    if n_rows <= sublane:
        return int(n_rows)            # single block; dims equal array dims
    row_bytes = max(1, lane_width * itemsize)
    tn = max(sublane, (_TILE_BYTES // row_bytes) // sublane * sublane)
    n_pad = ((n_rows + sublane - 1) // sublane) * sublane
    tn = min(tn, n_pad)
    # Prefer >= 4 grid steps so v7x's two TensorCores each get pipelined work.
    while pl.cdiv(n_rows, tn) < 4 and tn > sublane:
        tn = max(sublane, (tn // 2) // sublane * sublane)
    return int(tn)


# ---------------------------------------------------------------------------
# Forward
# ---------------------------------------------------------------------------

def dropout_forward(x, drop_mask, dropout_rate, training, *, donate_x=False):
    """Matches DropoutLayer.forward (torch.mul broadcasting semantics)."""
    orig_shape = x.shape
    if x.size == 0:
        scale = 1.0 if training else (1.0 - dropout_rate)
        return x * scale

    D = orig_shape[-1]
    N = int(np.prod(orig_shape[:-1])) if x.ndim > 1 else 1
    x2 = x.reshape(N, D)

    itemsize = jnp.dtype(x.dtype).itemsize
    sublane = _min_sublane_rows(itemsize)

    m2 = None
    per_feature = True
    if training:
        mask = drop_mask
        per_feature = (mask.ndim == 1)
        if per_feature:
            m2 = mask.reshape(1, D)                    # tiny, kept VMEM-resident
        else:
            # torch.mul broadcasting: materialize the broadcast mask (int8).
            m2 = jnp.broadcast_to(mask, orig_shape).reshape(N, D)
            sublane = max(sublane,
                          _min_sublane_rows(jnp.dtype(mask.dtype).itemsize))

    # Lane folding: fold k rows into the lane axis for wide, unmasked stores.
    k = _fold_factor(N, D)
    N2, D2 = N // k, D * k
    if k > 1:
        x2 = x2.reshape(N2, D2)
        if training:
            m2 = jnp.tile(m2, (1, k)) if per_feature else m2.reshape(N2, D2)

    tn = _pick_row_tile(N2, D2, itemsize, sublane)
    grid = (pl.cdiv(N2, tn),)

    x_spec = pl.BlockSpec((tn, D2), lambda i: (i, 0))
    out_spec = pl.BlockSpec((tn, D2), lambda i: (i, 0))
    common = dict(
        out_shape=jax.ShapeDtypeStruct((N2, D2), x.dtype),
        compiler_params=pltpu.CompilerParams(
            dimension_semantics=("parallel",)),
    )
    if donate_x:
        common["input_output_aliases"] = {0: 0}

    if training:
        m_spec = (pl.BlockSpec((1, D2), lambda i: (0, 0)) if per_feature
                  else pl.BlockSpec((tn, D2), lambda i: (i, 0)))
        out = pl.pallas_call(
            _mask_mul_kernel,
            grid_spec=pltpu.PrefetchScalarGridSpec(
                num_scalar_prefetch=0, grid=grid,
                in_specs=[x_spec, m_spec], out_specs=out_spec),
            **common,
        )(x2, m2)
    else:
        out = pl.pallas_call(
            functools.partial(_scale_kernel, scale=float(1.0 - dropout_rate)),
            grid_spec=pltpu.PrefetchScalarGridSpec(
                num_scalar_prefetch=0, grid=grid,
                in_specs=[x_spec], out_specs=out_spec),
            **common,
        )(x2)

    return out.reshape(orig_shape)


class DropoutLayer:
    """JAX mirror of the PyTorch DropoutLayer.

    The Bernoulli mask is generated host-side (like torch.bernoulli in
    __init__ / reset_dropout_mask) and stored as int8 so the per-row-mask
    path streams 1/4 the mask bytes; only the multiply runs in Pallas.
    """

    def __init__(self, input_size, dropout_rate=0.0, *, key):
        self.input_size = input_size
        self.dropout_rate = float(dropout_rate)
        self.drop_mask = jax.random.bernoulli(
            key, p=1.0 - self.dropout_rate,
            shape=(input_size,)).astype(jnp.int8)
        self.training = True

    def reset_dropout_mask(self, batch_size, *, key):
        self.drop_mask = jax.random.bernoulli(
            key, p=1.0 - self.dropout_rate,
            shape=(batch_size, self.input_size)).astype(jnp.int8)

    def __call__(self, x):
        return dropout_forward(x, self.drop_mask, self.dropout_rate,
                               self.training)


if __name__ == "__main__":
    key = jax.random.PRNGKey(0)
    kx, km, kb = jax.random.split(key, 3)

    B, L, input_size = 2, 8, 128
    dropout_rate = 0.25

    x = jax.random.normal(kx, (B, L, input_size), dtype=jnp.float32)
    layer = DropoutLayer(input_size, dropout_rate, key=km)

    # Training path, per-feature mask from __init__ (broadcast over batch/seq).
    layer.training = True
    y_train = jax.block_until_ready(layer(x))
    ref_train = x * layer.drop_mask.astype(x.dtype).reshape(1, 1, input_size)
    assert y_train.shape == x.shape
    assert jnp.allclose(y_train, ref_train, atol=1e-6, rtol=1e-6)

    # Training path, per-batch mask from reset_dropout_mask (rank-2 x, as in
    # the reference usage where torch.mul broadcasting is valid).
    xb = jax.random.normal(kb, (4, input_size), dtype=jnp.float32)
    layer.reset_dropout_mask(4, key=jax.random.fold_in(km, 1))
    y_batch = jax.block_until_ready(layer(xb))
    ref_batch = xb * layer.drop_mask.astype(xb.dtype)
    assert jnp.allclose(y_batch, ref_batch, atol=1e-6, rtol=1e-6)

    # Eval path: x * (1 - dropout_rate), no multiplier array.
    layer.training = False
    y_eval = jax.block_until_ready(layer(x))
    ref_eval = x * (1.0 - dropout_rate)
    assert jnp.allclose(y_eval, ref_eval, atol=1e-6, rtol=1e-6)

    print("KERNEL_OK")
</pallas_src>

<mosaic_0001>
module attributes {stable_mosaic.version = 11 : i64} {
  func.func @_mask_mul_kernel(%arg0: i32, %arg1: memref<1x2048xf32, #tpu.memory_space<vmem>>, %arg2: memref<1x2048xi8, #tpu.memory_space<vmem>>, %arg3: memref<1x2048xf32, #tpu.memory_space<vmem>>) attributes {dimension_semantics = [#tpu.dimension_semantics<parallel>], iteration_bounds = array<i64: 1>, scalar_prefetch = 0 : i64, scratch_operands = 0 : i64, tpu.core_type = #tpu.core_type<tc>, window_params = [{transform_indices = @transform_0, window_bounds = array<i64: 1, 2048>}, {pipeline_mode = #tpu.pipeline_mode<synchronous>, transform_indices = @transform_1, window_bounds = array<i64: 1, 2048>}, {transform_indices = @transform_2, window_bounds = array<i64: 1, 2048>}]} {
    %c0 = arith.constant 0 : index
    %c0_0 = arith.constant 0 : index
    %0 = vector.load %arg1[%c0, %c0_0] : memref<1x2048xf32, #tpu.memory_space<vmem>>, vector<1x2048xf32>
    %c0_1 = arith.constant 0 : index
    %c0_2 = arith.constant 0 : index
    %1 = vector.load %arg2[%c0_1, %c0_2] : memref<1x2048xi8, #tpu.memory_space<vmem>>, vector<1x2048xi8>
    %2 = arith.sitofp %1 : vector<1x2048xi8> to vector<1x2048xf32>
    %3 = arith.mulf %0, %2 : vector<1x2048xf32>
    %c0_3 = arith.constant 0 : index
    %c0_4 = arith.constant 0 : index
    %4 = vector.load %arg3[%c0_3, %c0_4] : memref<1x2048xf32, #tpu.memory_space<vmem>>, vector<1x2048xf32>
    tpu.vector_store %arg3[%c0_3, %c0_4], %3 {strides = array<i32>} : memref<1x2048xf32, #tpu.memory_space<vmem>>, vector<1x2048xf32>,
    return
  }
  func.func @transform_0(%arg0: i32) -> (i32, i32) {
    %c0_i32 = arith.constant 0 : i32
    %c0_i32_0 = arith.constant 0 : i32
    return %arg0, %c0_i32 : i32, i32
  }
  func.func @transform_1(%arg0: i32) -> (i32, i32) {
    %c0_i32 = arith.constant 0 : i32
    %c0_i32_0 = arith.constant 0 : i32
    %c0_i32_1 = arith.constant 0 : i32
    return %c0_i32, %c0_i32_0 : i32, i32
  }
  func.func @transform_2(%arg0: i32) -> (i32, i32) {
    %c0_i32 = arith.constant 0 : i32
    %c0_i32_0 = arith.constant 0 : i32
    return %arg0, %c0_i32 : i32, i32
  }
}

</mosaic_0001>

<bundles_post_ra>
// kernel: tpu_custom_call.1
= control target key start
LH: loop header
LB: loop body
LE: loop exit
PB: predicated region body
PF: predicated region fallthrough
CT: control target
= control target key end

     0   :  { %7 = vsyncpa [#allocation3], 0  ;;  %s249_s0 = inlined_call_operand.hbm [shape: f32[1,2048], index: 0, kind: input, shape index: {}]   ;;  %s250_s1 = inlined_call_operand.hbm [shape: s8[1,2048], index: 1, kind: input, shape index: {}]   ;;  %s251_s2 = inlined_call_operand.hbm [shape: f32[1,2048], index: 2, kind: output, shape index: {}]  }
   0x1   :  { %8 = vsyncpa [#allocation6], 0 }
   0x2   :  { %9 = vsyncpa [#allocation4], 0  ;;  %s15_s11 = sshll.u32 %s249_s0, 4  ;;  %s208_s12 = smov [#allocation2]   ;;  %s16_s11 = int_to_ptr.hbm [resolvable:$true] %s15_s11 }
   0x3   :  { %s17_s13 = sshll.u32 %s208_s12, 4  ;;  %s26_s16 = sshll.u32 %s250_s1, 4  ;;  %s18_s13 = int_to_ptr.vmem [resolvable:$true] %s17_s13  ;;  %s27_s16 = int_to_ptr.hbm [resolvable:$true] %s26_s16 }
   0x4   :  { %20 = dma.hbm_to_vmem [thread:$0]  %s16_s11, 256, %s18_s13, [#allocation3]  }
   0x5   :  { %s209_s17 = smov [#allocation5]  }
   0x6   :  { %s28_s18 = sshll.u32 %s209_s17, 4  ;;  %s29_s18 = int_to_ptr.vmem [resolvable:$true] %s28_s18 }
   0x7   :  { %31 = dma.hbm_to_vmem [thread:$0]  %s27_s16, 256, %s29_s18, [#allocation6]  }
   0x8   :  { %202 = dma.done.wait [#allocation3], 256  }
   0x9   :  { %203 = vsyncadd [#allocation3], 4294967040 }
   0xa   :  { %204 = dma.done.wait [#allocation6], 256  }
   0xb   :  { %205 = vsyncadd [#allocation6], 4294967040  ;;  %vm82_vm0 = vcmask 1040384   ;;  %vm84_vm1 = vcmask 1042434   ;;  %vm86_vm2 = vcmask 1041408   ;;  %v42_v0 = vld [vmem:[#allocation5] sm:$0xff] }
   0xc   :  { %vm88_vm3 = vcmask 1044484   ;;  %vm90_vm4 = vcmask 1046534   ;;  %vm92_vm5 = vcmask 1045508   ;;  %vm94_vm6 = vcmask 1043456   ;;  %v43_v5 = vld [vmem:[#allocation5 + $0x8] sm:$0xff]  ;;  %v40_v30 = vld [vmem:[#allocation2] sm:$0xff] }
   0xd   :  { %v44_v1 = vunpack.c.0.s8 %v42_v0  ;;  %v45_v2 = vunpack.c.1.s8 %v42_v0  ;;  %v46_v3 = vunpack.c.2.s8 %v42_v0  ;;  %v47_v4 = vunpack.c.3.s8 %v42_v0  ;;  %v41_v43 = vld [vmem:[#allocation2 + $0x8] sm:$0xff]  ;;  %s210_s0 = smov [#allocation7]   ;;  %s116_s21 = sshll.u32 %s251_s2, 4  ;;  %s117_s21 = int_to_ptr.hbm [resolvable:$true] %s116_s21 }
   0xe   :  { %v48_v6 = vunpack.c.0.s8 %v43_v5  ;;  %v49_v7 = vunpack.c.1.s8 %v43_v5  ;;  %v50_v8 = vunpack.c.2.s8 %v43_v5  ;;  %v51_v9 = vunpack.c.3.s8 %v43_v5  ;;  %s114_s1 = sshll.u32 %s210_s0, 4  ;;  %s115_s1 = int_to_ptr.vmem [resolvable:$true] %s114_s1 }
   0xf   :  { %v52_v10 = vcvt.s32.f32 %v44_v1  ;;  %v53_v11 = vcvt.s32.f32 %v45_v2  ;;  %v54_v12 = vcvt.s32.f32 %v46_v3  ;;  %v55_v13 = vcvt.s32.f32 %v47_v4 }
  0x10   :  { %v56_v14 = vcvt.s32.f32 %v48_v6  ;;  %v57_v15 = vcvt.s32.f32 %v49_v7  ;;  %v58_v16 = vcvt.s32.f32 %v50_v8  ;;  %v59_v17 = vcvt.s32.f32 %v51_v9 }
  0x11   :  { %v68_v18 = vrot.slane %v52_v10, 3  ;;  %v69_v19 = vrot.slane %v53_v11, 6  ;;  %v70_v20 = vrot.slane %v53_v11, 1  ;;  %v71_v21 = vrot.slane %v54_v12, 4 }
  0x12   :  { %v72_v22 = vrot.slane %v54_v12, 7  ;;  %v73_v23 = vrot.slane %v55_v13, 2  ;;  %v74_v24 = vrot.slane %v55_v13, 5  ;;  %v75_v25 = vrot.slane %v56_v14, 3 }
  0x13   :  { %v83_v26 = vsel %vm82_vm0, %v52_v10, %v68_v18  ;;  %v85_v27 = vsel %vm84_vm1, %v69_v19, %v70_v20  ;;  %v76_v28 = vrot.slane %v57_v15, 6  ;;  %v77_v29 = vrot.slane %v57_v15, 1 }
  0x14   :  { %v87_v31 = vsel %vm86_vm2, %v83_v26, %v85_v27  ;;  %v89_v32 = vsel %vm88_vm3, %v71_v21, %v72_v22  ;;  %v91_v33 = vsel %vm90_vm4, %v73_v23, %v74_v24  ;;  %v78_v34 = vrot.slane %v58_v16, 4 }
  0x15   :  { %v93_v35 = vsel %vm92_vm5, %v89_v32, %v91_v33  ;;  %v79_v36 = vrot.slane %v58_v16, 7  ;;  %v80_v37 = vrot.slane %v59_v17, 2  ;;  %v81_v38 = vrot.slane %v59_v17, 5 }
  0x16   :  { %v95_v39 = vsel %vm94_vm6, %v87_v31, %v93_v35  ;;  %v96_v40 = vsel %vm82_vm0, %v56_v14, %v75_v25  ;;  %v97_v41 = vsel %vm84_vm1, %v76_v28, %v77_v29 }
  0x17   :  { %v105_v42 = vmul.f32 %v95_v39, %v40_v30  ;;  %v98_v44 = vsel %vm86_vm2, %v96_v40, %v97_v41  ;;  %v99_v45 = vsel %vm88_vm3, %v78_v34, %v79_v36  ;;  %v100_v46 = vsel %vm90_vm4, %v80_v37, %v81_v38 }
  0x18   :  { %v101_v47 = vsel %vm92_vm5, %v99_v45, %v100_v46 }
  0x19   :  { %107 = vst [vmem:[#allocation7] sm:$0xff] %v105_v42  ;;  %v102_v48 = vsel %vm94_vm6, %v98_v44, %v101_v47 }
  0x1a   :  { %v106_v49 = vmul.f32 %v102_v48, %v41_v43 }
  0x1c   :  { %108 = vst [vmem:[#allocation7 + $0x8] sm:$0xff] %v106_v49 }
  0x1d   :  { %119 = dma.vmem_to_hbm [thread:$0]  %s115_s1, 256, %s117_s21, [#allocation4]  }
  0x1e   :  { %206 = dma.done.wait [#allocation4], 256  }
  0x1f   :  { %207 = vsyncadd [#allocation4], 4294967040 }
  0x20   :  { %124 = vsyncpa [#allocation3], 1 }
  0x21   :  { %125 = vsyncpa [#allocation6], 1 }
  0x22   :  { %126 = vsyncpa [#allocation4], 1 }

</bundles_post_ra>
